<compile_context>
chip_gen: v6e
topology: v6e:2x2x1
jax: 0.10.0
libtpu: 0.0.40
codegen_flags: <defaults>
</compile_context>

<pallas_src>
import functools
import math

import jax
import jax.numpy as jnp
from jax.experimental import pallas as pl
from jax.experimental.pallas import tpu as pltpu


FP = 128                     # padded feature width (lane-dense, MXU-friendly)
_SMALL_NPAD = 2048           # fully-resident single-kernel fast-path threshold
_TM = 256                    # row tile on the general path


def _round_up(v, m):
    return (v + m - 1) // m * m


def _pick_tk(npad):
    # npad is always a multiple of 512 on the general path, so the reduction
    # tile never falls back to 128 (128 tiles ~29% of HBM roofline vs ~85%+).
    for t in (2048, 1024, 512):
        if npad % t == 0:
            return t
    return 512  # unreachable


def _vmem_limit_bytes():
    # Generation-dependent scoped-VMEM budget: ~half of physical VMEM,
    # clamped to [32 MiB, 96 MiB].  v7x (64 MiB) -> 32 MiB; v5e/v6e (128 MiB)
    # -> 64 MiB.  Falls back to 32 MiB if the query is unavailable.
    try:
        cap = int(pltpu.get_tpu_info().vmem_capacity_bytes)
    except Exception:
        cap = 64 * 1024 * 1024
    return max(32 * 1024 * 1024, min(cap // 2, 96 * 1024 * 1024))


# ---------------------------------------------------------------------------
# Fast path: whole two-layer forward in a single pallas_call (small graphs).
# ---------------------------------------------------------------------------
def _fused_small_kernel(a_ref, x_ref, wt1_ref, wt2_ref, o_ref):
    a = a_ref[...]
    h1 = jnp.dot(x_ref[...], wt1_ref[...],
                 preferred_element_type=jnp.float32).astype(jnp.bfloat16)
    x1 = jnp.maximum(
        jnp.dot(a, h1, preferred_element_type=jnp.float32), 0.0
    ).astype(jnp.bfloat16)
    h2 = jnp.dot(x1, wt2_ref[...],
                 preferred_element_type=jnp.float32).astype(jnp.bfloat16)
    o_ref[...] = jnp.dot(a, h2, preferred_element_type=jnp.float32)


def _forward_small(adj_p, x_p, wt1, wt2, *, vmem_limit):
    npad = adj_p.shape[0]
    return pl.pallas_call(
        _fused_small_kernel,
        out_shape=jax.ShapeDtypeStruct((npad, FP), jnp.float32),
        grid_spec=pltpu.PrefetchScalarGridSpec(
            num_scalar_prefetch=0,
            grid=(1,),
            in_specs=[
                pl.BlockSpec((npad, npad), lambda i: (0, 0)),   # A (resident)
                pl.BlockSpec((npad, FP), lambda i: (0, 0)),     # x (resident)
                pl.BlockSpec((FP, FP), lambda i: (0, 0)),       # W1.T
                pl.BlockSpec((FP, FP), lambda i: (0, 0)),       # W2.T
            ],
            out_specs=pl.BlockSpec((npad, FP), lambda i: (0, 0)),
        ),
        compiler_params=pltpu.CompilerParams(
            dimension_semantics=("arbitrary",),
            vmem_limit_bytes=vmem_limit,
        ),
    )(adj_p, x_p, wt1, wt2)


# ---------------------------------------------------------------------------
# General path kernel 1: h1 = x @ W1.T   (row-tiled; tiny vs the aggregation)
# ---------------------------------------------------------------------------
def _xw_kernel(x_ref, wt_ref, h_ref):
    h_ref[...] = jnp.dot(
        x_ref[...], wt_ref[...], preferred_element_type=jnp.float32
    ).astype(h_ref.dtype)


def _linear_h(x_bf16, wt_bf16, *, tm, vmem_limit):
    npad = x_bf16.shape[0]
    return pl.pallas_call(
        _xw_kernel,
        out_shape=jax.ShapeDtypeStruct((npad, FP), jnp.bfloat16),
        grid_spec=pltpu.PrefetchScalarGridSpec(
            num_scalar_prefetch=0,
            grid=(npad // tm,),
            in_specs=[
                pl.BlockSpec((tm, FP), lambda i: (i, 0)),   # x row tile
                pl.BlockSpec((FP, FP), lambda i: (0, 0)),   # W.T (resident)
            ],
            out_specs=pl.BlockSpec((tm, FP), lambda i: (i, 0)),
        ),
        compiler_params=pltpu.CompilerParams(
            dimension_semantics=("parallel",),
            vmem_limit_bytes=vmem_limit,
        ),
    )(x_bf16, wt_bf16)


# ---------------------------------------------------------------------------
# General path kernel 2: h2 = relu(A @ h1) @ W2.T   (layer-1 agg + fused W2)
# ---------------------------------------------------------------------------
def _agg_fused_kernel(a_ref, h_ref, wt2_ref, o_ref, acc_ref, *, tk, h_resident):
    k = pl.program_id(1)

    @pl.when(k == 0)
    def _init():
        acc_ref[...] = jnp.zeros_like(acc_ref)

    if h_resident:
        kstart = pl.multiple_of(k * tk, tk)
        h_blk = h_ref[pl.ds(kstart, tk), :]      # resident h, slice K chunk
    else:
        h_blk = h_ref[...]                       # streamed (tk, FP) block
    acc_ref[...] += jnp.dot(a_ref[...], h_blk, preferred_element_type=jnp.float32)

    @pl.when(k == pl.num_programs(1) - 1)
    def _finalize():
        x1 = jnp.maximum(acc_ref[...], 0.0).astype(jnp.bfloat16)
        o_ref[...] = jnp.dot(
            x1, wt2_ref[...], preferred_element_type=jnp.float32
        ).astype(o_ref.dtype)


def _agg_fused(adj_bf16, h1, wt2, *, tm, tk, h_resident, vmem_limit):
    npad = adj_bf16.shape[0]
    if h_resident:
        h_spec = pl.BlockSpec((npad, FP), lambda i, k: (0, 0))   # fetched once
    else:
        h_spec = pl.BlockSpec((tk, FP), lambda i, k: (k, 0))     # K-streamed
    kernel = functools.partial(_agg_fused_kernel, tk=tk, h_resident=h_resident)
    return pl.pallas_call(
        kernel,
        out_shape=jax.ShapeDtypeStruct((npad, FP), jnp.bfloat16),
        grid_spec=pltpu.PrefetchScalarGridSpec(
            num_scalar_prefetch=0,
            grid=(npad // tm, npad // tk),
            in_specs=[
                pl.BlockSpec((tm, tk), lambda i, k: (i, k)),     # A streams
                h_spec,
                pl.BlockSpec((FP, FP), lambda i, k: (0, 0)),     # W2.T resident
            ],
            out_specs=pl.BlockSpec((tm, FP), lambda i, k: (i, 0)),
            scratch_shapes=[pltpu.VMEM((tm, FP), jnp.float32)],
        ),
        compiler_params=pltpu.CompilerParams(
            dimension_semantics=("parallel", "arbitrary"),
            vmem_limit_bytes=vmem_limit,
        ),
    )(adj_bf16, h1, wt2)


# ---------------------------------------------------------------------------
# General path kernel 3: y = A @ h2   (layer-2 agg; accumulate into f32 output)
# ---------------------------------------------------------------------------
def _agg_out_kernel(a_ref, h_ref, o_ref, *, tk, h_resident):
    k = pl.program_id(1)

    @pl.when(k == 0)
    def _init():
        o_ref[...] = jnp.zeros_like(o_ref)

    if h_resident:
        kstart = pl.multiple_of(k * tk, tk)
        h_blk = h_ref[pl.ds(kstart, tk), :]
    else:
        h_blk = h_ref[...]
    o_ref[...] += jnp.dot(a_ref[...], h_blk, preferred_element_type=jnp.float32)


def _agg_out(adj_bf16, h2, *, tm, tk, h_resident, vmem_limit):
    npad = adj_bf16.shape[0]
    if h_resident:
        h_spec = pl.BlockSpec((npad, FP), lambda i, k: (0, 0))
    else:
        h_spec = pl.BlockSpec((tk, FP), lambda i, k: (k, 0))
    kernel = functools.partial(_agg_out_kernel, tk=tk, h_resident=h_resident)
    return pl.pallas_call(
        kernel,
        out_shape=jax.ShapeDtypeStruct((npad, FP), jnp.float32),
        grid_spec=pltpu.PrefetchScalarGridSpec(
            num_scalar_prefetch=0,
            grid=(npad // tm, npad // tk),
            in_specs=[
                pl.BlockSpec((tm, tk), lambda i, k: (i, k)),     # A streams
                h_spec,
            ],
            out_specs=pl.BlockSpec((tm, FP), lambda i, k: (i, 0)),
        ),
        compiler_params=pltpu.CompilerParams(
            dimension_semantics=("parallel", "arbitrary"),
            vmem_limit_bytes=vmem_limit,
        ),
    )(adj_bf16, h2)


# ---------------------------------------------------------------------------
# Module wrapper
# ---------------------------------------------------------------------------
def glorot_uniform(key, out_dim, in_dim):
    # matches torch glorot: uniform(-stdv, stdv), stdv = sqrt(6/(fan_in+fan_out))
    stdv = math.sqrt(6.0 / (in_dim + out_dim))
    return jax.random.uniform(key, (out_dim, in_dim), jnp.float32, -stdv, stdv)


def my_gcn_forward(x, edge_index, counts, out_edge_index, params):
    """MyGCN forward: y = A @ (relu(A @ (x @ W1.T)) @ W2.T).

    Biases are structurally zero in MyGCN (both reset_parameters and the
    layer forward construct zero biases), so they are omitted.
    `counts` / `out_edge_index` are accepted only for API parity.
    """
    del counts, out_edge_index  # see TODO(synk) at top of file
    w1, w2 = params
    n, in_dim = x.shape
    hid1 = w1.shape[0]            # layer1 out features
    in2 = w2.shape[1]             # layer2 in features
    out_feats = w2.shape[0]       # layer2 out features
    assert max(in_dim, hid1, in2, out_feats) <= FP
    assert hid1 == in2, "layer2 input dim must equal layer1 output dim"

    # dense adjacency A[dst, src] = edge multiplicity (glue, plain JAX)
    src, dst = edge_index[0], edge_index[1]
    adj = jnp.zeros((n, n), jnp.float32).at[dst, src].add(1.0)
    # bf16 exactness guard on the adjacency cast (skipped when traced)
    try:
        max_mult = float(jnp.max(adj))
    except Exception:
        max_mult = None
    if max_mult is not None:
        assert max_mult <= 256.0, "edge multiplicity > 256 is not exact in bf16"

    bf = jnp.bfloat16
    vmem_limit = _vmem_limit_bytes()

    small = _round_up(n, 128) <= _SMALL_NPAD
    npad = _round_up(n, 128) if small else _round_up(n, 512)

    # zero-padded, lane-dense operands
    adj_p = jnp.zeros((npad, npad), bf).at[:n, :n].set(adj.astype(bf))
    x_p = jnp.zeros((npad, FP), bf).at[:n, :in_dim].set(x.astype(bf))
    wt1 = jnp.zeros((FP, FP), bf).at[:in_dim, :hid1].set(w1.T.astype(bf))
    wt2 = jnp.zeros((FP, FP), bf).at[:in2, :out_feats].set(w2.T.astype(bf))

    if small:
        y = _forward_small(adj_p, x_p, wt1, wt2, vmem_limit=vmem_limit)
    else:
        tm = _TM
        tk = _pick_tk(npad)
        # keep h resident only when its (double-buffered) footprint is small
        h_resident = (2 * npad * FP * 2) <= (vmem_limit // 2)
        h1 = _linear_h(x_p, wt1, tm=tm, vmem_limit=vmem_limit)
        h2 = _agg_fused(adj_p, h1, wt2, tm=tm, tk=tk,
                        h_resident=h_resident, vmem_limit=vmem_limit)
        y = _agg_out(adj_p, h2, tm=tm, tk=tk,
                     h_resident=h_resident, vmem_limit=vmem_limit)

    return y[:n, :out_feats]


# ---------------------------------------------------------------------------
# Test
# ---------------------------------------------------------------------------
if __name__ == "__main__":
    def build_graph(n):
        # bidirectional ring + self loops; edge_index = [src; dst]
        nodes = jnp.arange(n, dtype=jnp.int32)
        src = jnp.concatenate([nodes, nodes, nodes])
        dst = jnp.concatenate([(nodes + 1) % n, (nodes - 1) % n, nodes])
        edge_index = jnp.stack([src, dst], axis=0)
        counts = jnp.zeros((n,), jnp.int32).at[dst].add(1)       # in-degree
        out_edge_index = jnp.argsort(dst).astype(jnp.int32)      # edges by dst
        return edge_index, counts, out_edge_index

    def references(x, edge_index, w1, w2):
        n = x.shape[0]
        src, dst = edge_index[0], edge_index[1]
        adj = jnp.zeros((n, n), jnp.float32).at[dst, src].add(1.0)
        bf = jnp.bfloat16
        # reference 1: same-quantization chain (tight tolerance)
        a_q = adj.astype(bf)
        h0 = jnp.dot(x.astype(bf), w1.T.astype(bf),
                     preferred_element_type=jnp.float32).astype(bf)
        x1 = jnp.maximum(jnp.dot(a_q, h0, preferred_element_type=jnp.float32),
                         0.0).astype(bf)
        h1 = jnp.dot(x1, w2.T.astype(bf),
                     preferred_element_type=jnp.float32).astype(bf)
        y_q = jnp.dot(a_q, h1, preferred_element_type=jnp.float32)
        # reference 2: pure f32 semantics (loose tolerance)
        h_f = jnp.maximum(adj @ (x @ w1.T), 0.0)
        y_f = adj @ (h_f @ w2.T)
        return y_q, y_f

    in_dim, hidden_dim, out_dim = 8, 32, 32   # layer2 input dim == layer1 out
    key = jax.random.PRNGKey(0)
    kx1, kx2, kw1, kw2 = jax.random.split(key, 4)

    # parameters (glorot weights; biases are zeros in MyGCN)
    w1 = glorot_uniform(kw1, hidden_dim, in_dim)    # Linear(in_dim -> hidden)
    w2 = glorot_uniform(kw2, hidden_dim, out_dim)   # Linear(out_dim -> hidden)
    params = (w1, w2)

    # (tag, num_nodes, x-key): exercises both the fused single-kernel fast
    # path (npad=128) and the tiled general path (npad=2560).
    cases = [("small-fused", 64, kx1), ("large-tiled", 2500, kx2)]
    for tag, n, kx in cases:
        x = jax.random.normal(kx, (n, in_dim), jnp.float32)
        edge_index, counts, out_edge_index = build_graph(n)

        y = my_gcn_forward(x, edge_index, counts, out_edge_index, params)
        y = jax.block_until_ready(y)
        assert y.shape == (n, hidden_dim), tag

        y_ref_q, y_ref_f = references(x, edge_index, w1, w2)
        assert jnp.allclose(y, y_ref_q, atol=2e-3, rtol=2e-3), tag
        assert jnp.allclose(y, y_ref_f, atol=2.5e-1, rtol=1e-1), tag

    print("KERNEL_OK")
</pallas_src>

<mosaic_0001>
module attributes {stable_mosaic.version = 11 : i64} {
  func.func @_fused_small_kernel(%arg0: i32, %arg1: memref<128x128xbf16, #tpu.memory_space<vmem>>, %arg2: memref<128x128xbf16, #tpu.memory_space<vmem>>, %arg3: memref<128x128xbf16, #tpu.memory_space<vmem>>, %arg4: memref<128x128xbf16, #tpu.memory_space<vmem>>, %arg5: memref<128x128xf32, #tpu.memory_space<vmem>>) attributes {dimension_semantics = [#tpu.dimension_semantics<arbitrary>], iteration_bounds = array<i64: 1>, scalar_prefetch = 0 : i64, scratch_operands = 0 : i64, tpu.core_type = #tpu.core_type<tc>, window_params = [{pipeline_mode = #tpu.pipeline_mode<synchronous>, transform_indices = @transform_0, window_bounds = array<i64: 128, 128>}, {pipeline_mode = #tpu.pipeline_mode<synchronous>, transform_indices = @transform_1, window_bounds = array<i64: 128, 128>}, {pipeline_mode = #tpu.pipeline_mode<synchronous>, transform_indices = @transform_2, window_bounds = array<i64: 128, 128>}, {pipeline_mode = #tpu.pipeline_mode<synchronous>, transform_indices = @transform_3, window_bounds = array<i64: 128, 128>}, {pipeline_mode = #tpu.pipeline_mode<synchronous>, transform_indices = @transform_4, window_bounds = array<i64: 128, 128>}]} {
    %c0 = arith.constant 0 : index
    %c0_0 = arith.constant 0 : index
    %0 = vector.load %arg1[%c0, %c0_0] : memref<128x128xbf16, #tpu.memory_space<vmem>>, vector<128x128xbf16>
    %c0_1 = arith.constant 0 : index
    %c0_2 = arith.constant 0 : index
    %1 = vector.load %arg2[%c0_1, %c0_2] : memref<128x128xbf16, #tpu.memory_space<vmem>>, vector<128x128xbf16>
    %c0_3 = arith.constant 0 : index
    %c0_4 = arith.constant 0 : index
    %2 = vector.load %arg3[%c0_3, %c0_4] : memref<128x128xbf16, #tpu.memory_space<vmem>>, vector<128x128xbf16>
    %cst = arith.constant dense<0.000000e+00> : vector<128x128xf32>
    %3 = tpu.matmul %1, %2, %cst {dimension_numbers = #tpu.dot_dimension_numbers<[1], [0], [0], [1], [0, 0, 1, 1], [], []>} : vector<128x128xbf16>, vector<128x128xbf16>, vector<128x128xf32> -> vector<128x128xf32>
    %4 = arith.truncf %3 : vector<128x128xf32> to vector<128x128xbf16>
    %cst_5 = arith.constant dense<0.000000e+00> : vector<128x128xf32>
    %5 = tpu.matmul %0, %4, %cst_5 {dimension_numbers = #tpu.dot_dimension_numbers<[1], [0], [0], [1], [0, 0, 1, 1], [], []>} : vector<128x128xbf16>, vector<128x128xbf16>, vector<128x128xf32> -> vector<128x128xf32>
    %cst_6 = arith.constant 0.000000e+00 : f32
    %6 = vector.broadcast %cst_6 : f32 to vector<128x128xf32>
    %7 = arith.maximumf %5, %6 : vector<128x128xf32>
    %8 = arith.truncf %7 : vector<128x128xf32> to vector<128x128xbf16>
    %c0_7 = arith.constant 0 : index
    %c0_8 = arith.constant 0 : index
    %9 = vector.load %arg4[%c0_7, %c0_8] : memref<128x128xbf16, #tpu.memory_space<vmem>>, vector<128x128xbf16>
    %cst_9 = arith.constant dense<0.000000e+00> : vector<128x128xf32>
    %10 = tpu.matmul %8, %9, %cst_9 {dimension_numbers = #tpu.dot_dimension_numbers<[1], [0], [0], [1], [0, 0, 1, 1], [], []>} : vector<128x128xbf16>, vector<128x128xbf16>, vector<128x128xf32> -> vector<128x128xf32>
    %11 = arith.truncf %10 : vector<128x128xf32> to vector<128x128xbf16>
    %cst_10 = arith.constant dense<0.000000e+00> : vector<128x128xf32>
    %12 = tpu.matmul %0, %11, %cst_10 {dimension_numbers = #tpu.dot_dimension_numbers<[1], [0], [0], [1], [0, 0, 1, 1], [], []>} : vector<128x128xbf16>, vector<128x128xbf16>, vector<128x128xf32> -> vector<128x128xf32>
    %c0_11 = arith.constant 0 : index
    %c0_12 = arith.constant 0 : index
    %13 = vector.load %arg5[%c0_11, %c0_12] : memref<128x128xf32, #tpu.memory_space<vmem>>, vector<128x128xf32>
    tpu.vector_store %arg5[%c0_11, %c0_12], %12 {strides = array<i32>} : memref<128x128xf32, #tpu.memory_space<vmem>>, vector<128x128xf32>,
    return
  }
  func.func @transform_0(%arg0: i32) -> (i32, i32) {
    %c0_i32 = arith.constant 0 : i32
    %c0_i32_0 = arith.constant 0 : i32
    %c0_i32_1 = arith.constant 0 : i32
    return %c0_i32, %c0_i32_0 : i32, i32
  }
  func.func @transform_1(%arg0: i32) -> (i32, i32) {
    %c0_i32 = arith.constant 0 : i32
    %c0_i32_0 = arith.constant 0 : i32
    %c0_i32_1 = arith.constant 0 : i32
    return %c0_i32, %c0_i32_0 : i32, i32
  }
  func.func @transform_2(%arg0: i32) -> (i32, i32) {
    %c0_i32 = arith.constant 0 : i32
    %c0_i32_0 = arith.constant 0 : i32
    %c0_i32_1 = arith.constant 0 : i32
    return %c0_i32, %c0_i32_0 : i32, i32
  }
  func.func @transform_3(%arg0: i32) -> (i32, i32) {
    %c0_i32 = arith.constant 0 : i32
    %c0_i32_0 = arith.constant 0 : i32
    %c0_i32_1 = arith.constant 0 : i32
    return %c0_i32, %c0_i32_0 : i32, i32
  }
  func.func @transform_4(%arg0: i32) -> (i32, i32) {
    %c0_i32 = arith.constant 0 : i32
    %c0_i32_0 = arith.constant 0 : i32
    %c0_i32_1 = arith.constant 0 : i32
    return %c0_i32, %c0_i32_0 : i32, i32
  }
}

</mosaic_0001>

<bundles_post_ra>
// kernel: tpu_custom_call.1
= control target key start
LH: loop header
LB: loop body
LE: loop exit
PB: predicated region body
PF: predicated region fallthrough
CT: control target
= control target key end

     0   :  { %9 = vsyncpa [#allocation3], 0  ;;  %s1259_s0 = inlined_call_operand.hbm [shape: bf16[128,128], index: 0, kind: input, shape index: {}]   ;;  %s1260_s1 = inlined_call_operand.hbm [shape: bf16[128,128], index: 1, kind: input, shape index: {}]   ;;  %s1261_s2 = inlined_call_operand.hbm [shape: bf16[128,128], index: 2, kind: input, shape index: {}]   ;;  %s1262_s3 = inlined_call_operand.hbm [shape: bf16[128,128], index: 3, kind: input, shape index: {}]   ;;  %s1263_s4 = inlined_call_operand.hbm [shape: f32[128,128], index: 4, kind: output, shape index: {}]  }
   0x1   :  { %10 = vsyncpa [#allocation6], 0 }
   0x2   :  { %11 = vsyncpa [#allocation9], 0 }
   0x3   :  { %12 = vsyncpa [#allocation4], 0  ;;  %s1166_s15 = smov [#allocation5]   ;;  %s1167_s17 = smov [#allocation2]  }
   0x4   :  { %s30_s16 = sshll.u32 %s1166_s15, 4  ;;  %s18_s18 = sshll.u32 %s1167_s17, 4  ;;  %s31_s16 = int_to_ptr.vmem [resolvable:$true] %s30_s16  ;;  %s19_s18 = int_to_ptr.vmem [resolvable:$true] %s18_s18 }
   0x5   :  { %s1066_s19 = scalar_lea.vmem %s31_s16, 1024  ;;  %p1071_p1 = scmp.lt.s32.totalorder %s31_s16, %s31_s16 }
   0x6   :  { %p1067_p0 = scmp.ne.s32.totalorder %s31_s16, %s1066_s19  ;;  %p1072_p2 = scmp.lt.s32.totalorder %s1066_s19, %s1066_s19 }
   0x8   :  { %p1073_p3 = por %p1072_p2, %p1071_p1 }
   0xa   :  { %p1074_p4 = pnand %p1073_p3, %p1067_p0 }
   0xc   :  { %1077 = shalt.err (!%p1074_p4)
}
   0xd   :  { %s1168_s20 = smov 64   ;;  %s1169_s21 = smov 4  }
   0xe   :  { %36 = dma.hbm_to_vmem [thread:$0]  %s1260_s1, 1024, %s31_s16, [#allocation6], %s1168_s20, %s1168_s20, %s1169_s21  }
   0xf   :  { %s1086_s24 = scalar_lea.vmem %s19_s18, 1024  ;;  %p1091_p6 = scmp.lt.s32.totalorder %s19_s18, %s19_s18 }
  0x10   :  { %p1087_p5 = scmp.ne.s32.totalorder %s19_s18, %s1086_s24  ;;  %p1092_p7 = scmp.lt.s32.totalorder %s1086_s24, %s1086_s24 }
  0x12   :  { %p1093_p8 = por %p1092_p7, %p1091_p6 }
  0x14   :  { %p1094_p9 = pnand %p1093_p8, %p1087_p5 }
  0x16   :  { %1097 = shalt.err (!%p1094_p9)
}
  0x17   :  { %24 = dma.hbm_to_vmem [thread:$0]  %s1259_s0, 1024, %s19_s18, [#allocation3], %s1168_s20, %s1168_s20, %s1169_s21  }
  0x18   :  { %s1170_s27 = smov [#allocation7]   ;;  %s1171_s29 = smov [#allocation8]  }
  0x19   :  { %s42_s28 = sshll.u32 %s1170_s27, 4  ;;  %s54_s30 = sshll.u32 %s1171_s29, 4  ;;  %s43_s28 = int_to_ptr.vmem [resolvable:$true] %s42_s28  ;;  %s55_s30 = int_to_ptr.vmem [resolvable:$true] %s54_s30 }
  0x1a   :  { %s1106_s1 = scalar_lea.vmem %s43_s28, 1024  ;;  %p1111_p11 = scmp.lt.s32.totalorder %s43_s28, %s43_s28 }
  0x1b   :  { %p1107_p10 = scmp.ne.s32.totalorder %s43_s28, %s1106_s1  ;;  %p1112_p12 = scmp.lt.s32.totalorder %s1106_s1, %s1106_s1 }
  0x1d   :  { %p1113_p13 = por %p1112_p12, %p1111_p11 }
  0x1f   :  { %p1114_p0 = pnand %p1113_p13, %p1107_p10 }
  0x21   :  { %1117 = shalt.err (!%p1114_p0)
}
  0x22   :  { %48 = dma.hbm_to_vmem [thread:$0]  %s1261_s2, 1024, %s43_s28, [#allocation6], %s1168_s20, %s1168_s20, %s1169_s21  }
  0x23   :  { %s1126_s0 = scalar_lea.vmem %s55_s30, 1024  ;;  %p1131_p2 = scmp.lt.s32.totalorder %s55_s30, %s55_s30 }
  0x24   :  { %p1127_p1 = scmp.ne.s32.totalorder %s55_s30, %s1126_s0  ;;  %p1132_p3 = scmp.lt.s32.totalorder %s1126_s0, %s1126_s0 }
  0x26   :  { %p1133_p4 = por %p1132_p3, %p1131_p2 }
  0x28   :  { %p1134_p5 = pnand %p1133_p4, %p1127_p1 }
  0x2a   :  { %1137 = shalt.err (!%p1134_p5)
}
  0x2b   :  { %60 = dma.hbm_to_vmem [thread:$0]  %s1262_s3, 1024, %s55_s30, [#allocation9], %s1168_s20, %s1168_s20, %s1169_s21  }
  0x2c   :  { %1158 = dma.done.wait [#allocation3], 1024  }
  0x2d   :  { %1159 = vsyncadd [#allocation3], 4294966272 }
  0x2e   :  { %1160 = dma.done.wait [#allocation6], 2048  }
  0x2f   :  { %1161 = vsyncadd [#allocation6], 4294965248 }
  0x30   :  { %1162 = dma.done.wait [#allocation9], 1024  }
  0x31   :  { %1163 = vsyncadd [#allocation9], 4294966272  ;;  %v1026_v0 = vld [vmem:[#allocation7 + $0x38] sm:$0xff]   ;;  %v1027_v1 = vld [vmem:[#allocation7 + $0x30] sm:$0xff]   ;;  %s1172_s2 = smov [#allocation10]  }
  0x32   :  { %889 = vmatprep.subr.bf16.mxu0 %v1026_v0  ;;  %v1028_v2 = vld [vmem:[#allocation7 + $0x28] sm:$0xff]   ;;  %v1029_v3 = vld [vmem:[#allocation7 + $0x20] sm:$0xff]   ;;  %v1030_v5 = vld [vmem:[#allocation7 + $0x18] sm:$0xff]   ;;  %s779_s3 = sshll.u32 %s1172_s2, 4  ;;  %s780_s3 = int_to_ptr.vmem [resolvable:$true] %s779_s3 }
  0x33   :  { %890 = vmatpush3.bf16.msra.mxu0 %v1026_v0  ;;  %v1034_v4 = vld [vmem:[#allocation5] sm:$0xff]   ;;  %v1031_v6 = vld [vmem:[#allocation7 + $0x10] sm:$0xff]   ;;  %v1032_v7 = vld [vmem:[#allocation7 + $0x8] sm:$0xff]   ;;  %s1138_s9 = scalar_lea.vmem %s780_s3, 2048  ;;  %p1143_p7 = scmp.lt.s32.totalorder %s780_s3, %s780_s3 }
  0x34   :  { %891 = vmatprep.subr.bf16.mxu0 %v1027_v1  ;;  %905 = vmatprep.mubr.bf16.mxu0 %v1034_v4  ;;  %v1033_v8 = vld [vmem:[#allocation7] sm:$0xff]   ;;  %v1035_v9 = vld [vmem:[#allocation5 + $0x8] sm:$0xff]   ;;  %v1036_v10 = vld [vmem:[#allocation5 + $0x10] sm:$0xff]   ;;  %p1139_p6 = scmp.ne.s32.totalorder %s780_s3, %s1138_s9  ;;  %p1144_p8 = scmp.lt.s32.totalorder %s1138_s9, %s1138_s9 }
  0x35   :  { %v1037_v11 = vld [vmem:[#allocation5 + $0x18] sm:$0xff]   ;;  %v1038_v12 = vld [vmem:[#allocation5 + $0x20] sm:$0xff]   ;;  %v1039_v13 = vld [vmem:[#allocation5 + $0x28] sm:$0xff]  }
  0x36   :  { %v1040_v14 = vld [vmem:[#allocation5 + $0x30] sm:$0xff]   ;;  %v1041_v15 = vld [vmem:[#allocation5 + $0x38] sm:$0xff]   ;;  %v1224_v16 = vld [vmem:[#allocation2] sm:$0xff]   ;;  %p1145_p9 = por %p1144_p8, %p1143_p7 }
  0x37   :  { %892 = vmatpush3.bf16.msra.mxu0 %v1027_v1  ;;  %937 = vmatprep.mubr.bf16.mxu1 %v1224_v16  ;;  %v1050_v17 = vld [vmem:[#allocation8 + $0x38] sm:$0xff]   ;;  %v1051_v18 = vld [vmem:[#allocation8 + $0x30] sm:$0xff]   ;;  %v1052_v19 = vld [vmem:[#allocation8 + $0x28] sm:$0xff]  }
  0x38   :  { %893 = vmatprep.subr.bf16.mxu0 %v1028_v2  ;;  %v1053_v20 = vld [vmem:[#allocation8 + $0x20] sm:$0xff]   ;;  %v1054_v21 = vld [vmem:[#allocation8 + $0x18] sm:$0xff]   ;;  %v1227_v46 = vld [vmem:[#allocation2 + $0x8] sm:$0xff]   ;;  %p1146_p10 = pnand %p1145_p9, %p1139_p6 }
  0x39   :  { %v1229_v47 = vld [vmem:[#allocation2 + $0x10] sm:$0xff]   ;;  %v1233_v48 = vld [vmem:[#allocation2 + $0x18] sm:$0xff]   ;;  %v1235_v49 = vld [vmem:[#allocation2 + $0x20] sm:$0xff]  }
  0x3a   :  { %v1239_v50 = vld [vmem:[#allocation2 + $0x28] sm:$0xff]   ;;  %v1241_v51 = vld [vmem:[#allocation2 + $0x30] sm:$0xff]   ;;  %v1245_v52 = vld [vmem:[#allocation2 + $0x38] sm:$0xff]  }
  0x3b   :  { %894 = vmatpush3.bf16.msra.mxu0 %v1028_v2  ;;  %v1055_v53 = vld [vmem:[#allocation8 + $0x10] sm:$0xff]   ;;  %v1056_v54 = vld [vmem:[#allocation8 + $0x8] sm:$0xff]   ;;  %v1057_v55 = vld [vmem:[#allocation8] sm:$0xff]  }
  0x3c   :  { %895 = vmatprep.subr.bf16.mxu0 %v1029_v3 }
  0x3f   :  { %896 = vmatpush3.bf16.msra.mxu0 %v1029_v3 }
  0x40   :  { %897 = vmatprep.subr.bf16.mxu0 %v1030_v5 }
  0x43   :  { %898 = vmatpush3.bf16.msra.mxu0 %v1030_v5 }
  0x44   :  { %899 = vmatprep.subr.bf16.mxu0 %v1031_v6 }
  0x47   :  { %900 = vmatpush3.bf16.msra.mxu0 %v1031_v6 }
  0x48   :  { %901 = vmatprep.subr.bf16.mxu0 %v1032_v7 }
  0x4b   :  { %902 = vmatpush3.bf16.msra.mxu0 %v1032_v7 }
  0x4c   :  { %903 = vmatprep.subr.bf16.mxu0 %v1033_v8 }
  0x4f   :  { %904 = vmatpush3.bf16.msra.mxu0 %v1033_v8 }
  0x50   :  { %953 = vmatprep.subr.bf16.mxu0 %v1050_v17 }
  0x52   :  { %906 = vmatmul.mubr.bf16.vlgmr.msra.gmra.mxu0 %v1035_v9 }
  0x53   :  { %909 = vmatprep.mubr.bf16.mxu0 %v1036_v10  ;;  %954 = vmatpush3.bf16.msra.mxu0 %v1050_v17 }
  0x54   :  { %955 = vmatprep.subr.bf16.mxu0 %v1051_v18 }
  0x57   :  { %956 = vmatpush3.bf16.msra.mxu0 %v1051_v18 }
  0x58   :  { %957 = vmatprep.subr.bf16.mxu0 %v1052_v19 }
  0x5a   :  { %910 = vmatmul.mubr.bf16.gmra.mxu0 %v1037_v11 }
  0x5b   :  { %913 = vmatprep.mubr.bf16.mxu0 %v1038_v12  ;;  %958 = vmatpush3.bf16.msra.mxu0 %v1052_v19 }
  0x5c   :  { %959 = vmatprep.subr.bf16.mxu0 %v1053_v20 }
  0x5f   :  { %960 = vmatpush3.bf16.msra.mxu0 %v1053_v20 }
  0x60   :  { %961 = vmatprep.subr.bf16.mxu0 %v1054_v21 }
  0x62   :  { %914 = vmatmul.mubr.bf16.gmra.mxu0 %v1039_v13 }
  0x63   :  { %917 = vmatprep.mubr.bf16.mxu0 %v1040_v14  ;;  %962 = vmatpush3.bf16.msra.mxu0 %v1054_v21 }
  0x64   :  { %963 = vmatprep.subr.bf16.mxu0 %v1055_v53 }
  0x67   :  { %964 = vmatpush3.bf16.msra.mxu0 %v1055_v53 }
  0x68   :  { %965 = vmatprep.subr.bf16.mxu0 %v1056_v54 }
  0x6a   :  { %918 = vmatmul.mubr.bf16.gmra.mxu0 %v1041_v15 }
  0x6b   :  { %966 = vmatpush3.bf16.msra.mxu0 %v1056_v54 }
  0x6c   :  { %967 = vmatprep.subr.bf16.mxu0 %v1057_v55 }
  0x6f   :  { %968 = vmatpush3.bf16.msra.mxu0 %v1057_v55 }
 0x112   :  { %v907_v22 = vpop.f32.mrf.mxu0 }
 0x114   :  { %v252_v23 = vpop.f32.mrf.mxu0 }
 0x116   :  { %v908_v24 = vpop.f32.mrf.mxu0 }
 0x117   :  { %v316_v44 = vpack.c.bf16 %v908_v24, %v907_v22 }
 0x118   :  { %v255_v25 = vpop.f32.mrf.mxu0 }
 0x119   :  { %v315_v45 = vpack.c.bf16 %v255_v25, %v252_v23 }
 0x11a   :  { %v911_v26 = vpop.f32.mrf.mxu0 }
 0x11c   :  { %v268_v27 = vpop.f32.mrf.mxu0 }
 0x11e   :  { %v912_v28 = vpop.f32.mrf.mxu0 }
 0x11f   :  { %v318_v42 = vpack.c.bf16 %v912_v28, %v911_v26 }
 0x120   :  { %v271_v29 = vpop.f32.mrf.mxu0 }
 0x121   :  { %v317_v43 = vpack.c.bf16 %v271_v29, %v268_v27 }
 0x122   :  { %v915_v30 = vpop.f32.mrf.mxu0 }
 0x124   :  { %v284_v31 = vpop.f32.mrf.mxu0 }
 0x126   :  { %v916_v32 = vpop.f32.mrf.mxu0 }
 0x127   :  { %v320_v40 = vpack.c.bf16 %v916_v32, %v915_v30 }
 0x128   :  { %v287_v33 = vpop.f32.mrf.mxu0 }
 0x129   :  { %v319_v41 = vpack.c.bf16 %v287_v33, %v284_v31 }
 0x12a   :  { %v919_v34 = vpop.f32.mrf.mxu0 }
 0x12c   :  { %v300_v35 = vpop.f32.mrf.mxu0 }
 0x12e   :  { %v920_v36 = vpop.f32.mrf.mxu0 }
 0x12f   :  { %v322_v37 = vpack.c.bf16 %v920_v36, %v919_v34 }
 0x130   :  { %v303_v38 = vpop.f32.mrf.mxu0 }
 0x131   :  { %v321_v39 = vpack.c.bf16 %v303_v38, %v300_v35  ;;  %921 = vmatprep.subr.bf16.mxu1 %v322_v37 }
 0x132   :  { %922 = vmatpush3.bf16.msra.mxu1 %v322_v37 }
 0x133   :  { %923 = vmatprep.subr.bf16.mxu1 %v321_v39 }
 0x136   :  { %924 = vmatpush3.bf16.msra.mxu1 %v321_v39 }
 0x137   :  { %925 = vmatprep.subr.bf16.mxu1 %v320_v40 }
 0x13a   :  { %926 = vmatpush3.bf16.msra.mxu1 %v320_v40 }
 0x13b   :  { %927 = vmatprep.subr.bf16.mxu1 %v319_v41 }
 0x13e   :  { %928 = vmatpush3.bf16.msra.mxu1 %v319_v41 }
 0x13f   :  { %929 = vmatprep.subr.bf16.mxu1 %v318_v42 }
 0x142   :  { %930 = vmatpush3.bf16.msra.mxu1 %v318_v42 }
 0x143   :  { %931 = vmatprep.subr.bf16.mxu1 %v317_v43 }
 0x146   :  { %932 = vmatpush3.bf16.msra.mxu1 %v317_v43 }
 0x147   :  { %933 = vmatprep.subr.bf16.mxu1 %v316_v44 }
 0x14a   :  { %934 = vmatpush3.bf16.msra.mxu1 %v316_v44 }
 0x14b   :  { %935 = vmatprep.subr.bf16.mxu1 %v315_v45 }
 0x14e   :  { %936 = vmatpush3.bf16.msra.mxu1 %v315_v45 }
 0x151   :  { %938 = vmatmul.mubr.bf16.vlgmr.msra.gmra.mxu1 %v1227_v46 }
 0x152   :  { %941 = vmatprep.mubr.bf16.mxu1 %v1229_v47 }
 0x159   :  { %942 = vmatmul.mubr.bf16.gmra.mxu1 %v1233_v48 }
 0x15a   :  { %945 = vmatprep.mubr.bf16.mxu1 %v1235_v49 }
 0x161   :  { %946 = vmatmul.mubr.bf16.gmra.mxu1 %v1239_v50 }
 0x162   :  { %949 = vmatprep.mubr.bf16.mxu1 %v1241_v51 }
 0x169   :  { %950 = vmatmul.mubr.bf16.gmra.mxu1 %v1245_v52 }
 0x16a   :  { %1001 = vmatprep.mubr.bf16.mxu1 %v1224_v16 }
 0x211   :  { %v939_v56 = vpop.f32.mrf.mxu1 }
 0x212   :  { %v470_v63 = vmax.f32 %v939_v56, 0.0 }
 0x213   :  { %v405_v57 = vpop.f32.mrf.mxu1 }
 0x214   :  { %v468_v61 = vmax.f32 %v405_v57, 0.0 }
 0x215   :  { %v940_v58 = vpop.f32.mrf.mxu1 }
 0x216   :  { %v471_v59 = vmax.f32 %v940_v58, 0.0 }
 0x217   :  { %v408_v60 = vpop.f32.mrf.mxu1 }
 0x218   :  { %v469_v62 = vmax.f32 %v408_v60, 0.0  ;;  %v485_v2 = vpack.c.bf16 %v471_v59, %v470_v63 }
 0x219   :  { %v943_v0 = vpop.f32.mrf.mxu1 }
 0x21a   :  { %v484_v1 = vpack.c.bf16 %v469_v62, %v468_v61  ;;  %v474_v9 = vmax.f32 %v943_v0, 0.0 }
 0x21b   :  { %v421_v3 = vpop.f32.mrf.mxu1 }
 0x21c   :  { %969 = vmatprep.mubr.bf16.mxu0 %v484_v1  ;;  %v472_v7 = vmax.f32 %v421_v3, 0.0 }
 0x21d   :  { %v944_v4 = vpop.f32.mrf.mxu1  ;;  %970 = vmatmul.mubr.bf16.vlgmr.msra.gmra.mxu0 %v485_v2 }
 0x21e   :  { %v475_v5 = vmax.f32 %v944_v4, 0.0 }
 0x21f   :  { %v424_v6 = vpop.f32.mrf.mxu1 }
 0x220   :  { %v473_v8 = vmax.f32 %v424_v6, 0.0  ;;  %v487_v12 = vpack.c.bf16 %v475_v5, %v474_v9 }
 0x221   :  { %v947_v10 = vpop.f32.mrf.mxu1 }
 0x222   :  { %v486_v11 = vpack.c.bf16 %v473_v8, %v472_v7  ;;  %v478_v19 = vmax.f32 %v947_v10, 0.0 }
 0x223   :  { %v437_v13 = vpop.f32.mrf.mxu1 }
 0x224   :  { %973 = vmatprep.mubr.bf16.mxu0 %v486_v11  ;;  %v476_v17 = vmax.f32 %v437_v13, 0.0 }
 0x225   :  { %v948_v14 = vpop.f32.mrf.mxu1  ;;  %974 = vmatmul.mubr.bf16.gmra.mxu0 %v487_v12 }
 0x226   :  { %v479_v15 = vmax.f32 %v948_v14, 0.0 }
 0x227   :  { %v440_v16 = vpop.f32.mrf.mxu1 }
 0x228   :  { %v477_v18 = vmax.f32 %v440_v16, 0.0  ;;  %v489_v22 = vpack.c.bf16 %v479_v15, %v478_v19 }
 0x229   :  { %v951_v20 = vpop.f32.mrf.mxu1 }
 0x22a   :  { %v488_v21 = vpack.c.bf16 %v477_v18, %v476_v17  ;;  %v482_v29 = vmax.f32 %v951_v20, 0.0 }
 0x22b   :  { %v453_v23 = vpop.f32.mrf.mxu1 }
 0x22c   :  { %977 = vmatprep.mubr.bf16.mxu0 %v488_v21  ;;  %v480_v27 = vmax.f32 %v453_v23, 0.0 }
 0x22d   :  { %v952_v24 = vpop.f32.mrf.mxu1  ;;  %978 = vmatmul.mubr.bf16.gmra.mxu0 %v489_v22 }
 0x22e   :  { %v483_v25 = vmax.f32 %v952_v24, 0.0 }
 0x22f   :  { %v456_v26 = vpop.f32.mrf.mxu1 }
 0x230   :  { %v481_v28 = vmax.f32 %v456_v26, 0.0  ;;  %v491_v31 = vpack.c.bf16 %v483_v25, %v482_v29 }
 0x232   :  { %v490_v30 = vpack.c.bf16 %v481_v28, %v480_v27 }
 0x234   :  { %981 = vmatprep.mubr.bf16.mxu0 %v490_v30 }
 0x235   :  { %982 = vmatmul.mubr.bf16.gmra.mxu0 %v491_v31 }
 0x2dd   :  { %v971_v32 = vpop.f32.mrf.mxu0 }
 0x2df   :  { %v590_v33 = vpop.f32.mrf.mxu0 }
 0x2e1   :  { %v972_v34 = vpop.f32.mrf.mxu0 }
 0x2e2   :  { %v654_v61 = vpack.c.bf16 %v972_v34, %v971_v32 }
 0x2e3   :  { %v593_v35 = vpop.f32.mrf.mxu0 }
 0x2e4   :  { %v653_v62 = vpack.c.bf16 %v593_v35, %v590_v33 }
 0x2e5   :  { %v975_v36 = vpop.f32.mrf.mxu0 }
 0x2e7   :  { %v606_v37 = vpop.f32.mrf.mxu0 }
 0x2e9   :  { %v976_v38 = vpop.f32.mrf.mxu0 }
 0x2ea   :  { %v656_v59 = vpack.c.bf16 %v976_v38, %v975_v36 }
 0x2eb   :  { %v609_v39 = vpop.f32.mrf.mxu0 }
 0x2ec   :  { %v655_v60 = vpack.c.bf16 %v609_v39, %v606_v37 }
 0x2ed   :  { %v979_v40 = vpop.f32.mrf.mxu0 }
 0x2ef   :  { %v622_v41 = vpop.f32.mrf.mxu0 }
 0x2f1   :  { %v980_v42 = vpop.f32.mrf.mxu0 }
 0x2f2   :  { %v658_v57 = vpack.c.bf16 %v980_v42, %v979_v40 }
 0x2f3   :  { %v625_v43 = vpop.f32.mrf.mxu0 }
 0x2f4   :  { %v657_v58 = vpack.c.bf16 %v625_v43, %v622_v41 }
 0x2f5   :  { %v983_v44 = vpop.f32.mrf.mxu0 }
 0x2f7   :  { %v638_v45 = vpop.f32.mrf.mxu0 }
 0x2f9   :  { %v984_v53 = vpop.f32.mrf.mxu0 }
 0x2fa   :  { %v660_v54 = vpack.c.bf16 %v984_v53, %v983_v44 }
 0x2fb   :  { %v641_v55 = vpop.f32.mrf.mxu0 }
 0x2fc   :  { %v659_v56 = vpack.c.bf16 %v641_v55, %v638_v45  ;;  %985 = vmatprep.subr.bf16.mxu1 %v660_v54 }
 0x2fd   :  { %986 = vmatpush3.bf16.msra.mxu1 %v660_v54 }
 0x2fe   :  { %987 = vmatprep.subr.bf16.mxu1 %v659_v56 }
 0x301   :  { %988 = vmatpush3.bf16.msra.mxu1 %v659_v56 }
 0x302   :  { %989 = vmatprep.subr.bf16.mxu1 %v658_v57 }
 0x305   :  { %990 = vmatpush3.bf16.msra.mxu1 %v658_v57 }
 0x306   :  { %991 = vmatprep.subr.bf16.mxu1 %v657_v58 }
 0x309   :  { %992 = vmatpush3.bf16.msra.mxu1 %v657_v58 }
 0x30a   :  { %993 = vmatprep.subr.bf16.mxu1 %v656_v59 }
 0x30d   :  { %994 = vmatpush3.bf16.msra.mxu1 %v656_v59 }
 0x30e   :  { %995 = vmatprep.subr.bf16.mxu1 %v655_v60 }
 0x311   :  { %996 = vmatpush3.bf16.msra.mxu1 %v655_v60 }
 0x312   :  { %997 = vmatprep.subr.bf16.mxu1 %v654_v61 }
 0x315   :  { %998 = vmatpush3.bf16.msra.mxu1 %v654_v61 }
 0x316   :  { %999 = vmatprep.subr.bf16.mxu1 %v653_v62 }
 0x319   :  { %1000 = vmatpush3.bf16.msra.mxu1 %v653_v62 }
 0x31c   :  { %1002 = vmatmul.mubr.bf16.vlgmr.msra.gmra.mxu1 %v1227_v46 }
 0x31d   :  { %1005 = vmatprep.mubr.bf16.mxu1 %v1229_v47 }
 0x324   :  { %1006 = vmatmul.mubr.bf16.gmra.mxu1 %v1233_v48 }
 0x325   :  { %1009 = vmatprep.mubr.bf16.mxu1 %v1235_v49 }
 0x32c   :  { %1010 = vmatmul.mubr.bf16.gmra.mxu1 %v1239_v50 }
 0x32d   :  { %1013 = vmatprep.mubr.bf16.mxu1 %v1241_v51 }
 0x334   :  { %1014 = vmatmul.mubr.bf16.gmra.mxu1 %v1245_v52 }
 0x3dc   :  { %v1003_v63 = vpop.f32.mrf.mxu1 }
 0x3dd   :  { %760 = vst [vmem:[#allocation10 + $0x10] sm:$0xff] %v1003_v63 }
 0x3de   :  { %v695_v0 = vpop.f32.mrf.mxu1 }
 0x3df   :  { %758 = vst [vmem:[#allocation10] sm:$0xff] %v695_v0 }
 0x3e0   :  { %v1004_v1 = vpop.f32.mrf.mxu1 }
 0x3e1   :  { %761 = vst [vmem:[#allocation10 + $0x18] sm:$0xff] %v1004_v1 }
 0x3e2   :  { %v698_v2 = vpop.f32.mrf.mxu1 }
 0x3e3   :  { %759 = vst [vmem:[#allocation10 + $0x8] sm:$0xff] %v698_v2 }
 0x3e4   :  { %v1007_v46 = vpop.f32.mrf.mxu1 }
 0x3e5   :  { %764 = vst [vmem:[#allocation10 + $0x30] sm:$0xff] %v1007_v46 }
 0x3e6   :  { %v711_v47 = vpop.f32.mrf.mxu1 }
 0x3e7   :  { %762 = vst [vmem:[#allocation10 + $0x20] sm:$0xff] %v711_v47 }
 0x3e8   :  { %v1008_v48 = vpop.f32.mrf.mxu1 }
 0x3e9   :  { %765 = vst [vmem:[#allocation10 + $0x38] sm:$0xff] %v1008_v48 }
 0x3ea   :  { %v714_v49 = vpop.f32.mrf.mxu1 }
 0x3eb   :  { %763 = vst [vmem:[#allocation10 + $0x28] sm:$0xff] %v714_v49 }
 0x3ec   :  { %v1011_v50 = vpop.f32.mrf.mxu1 }
 0x3ed   :  { %768 = vst [vmem:[#allocation10 + $0x50] sm:$0xff] %v1011_v50 }
 0x3ee   :  { %v727_v51 = vpop.f32.mrf.mxu1 }
 0x3ef   :  { %766 = vst [vmem:[#allocation10 + $0x40] sm:$0xff] %v727_v51 }
 0x3f0   :  { %v1012_v52 = vpop.f32.mrf.mxu1 }
 0x3f1   :  { %769 = vst [vmem:[#allocation10 + $0x58] sm:$0xff] %v1012_v52 }
 0x3f2   :  { %v730_v3 = vpop.f32.mrf.mxu1 }
 0x3f3   :  { %767 = vst [vmem:[#allocation10 + $0x48] sm:$0xff] %v730_v3 }
 0x3f4   :  { %v1015_v4 = vpop.f32.mrf.mxu1 }
 0x3f5   :  { %772 = vst [vmem:[#allocation10 + $0x70] sm:$0xff] %v1015_v4 }
 0x3f6   :  { %v743_v5 = vpop.f32.mrf.mxu1 }
 0x3f7   :  { %770 = vst [vmem:[#allocation10 + $0x60] sm:$0xff] %v743_v5 }
 0x3f8   :  { %v1016_v6 = vpop.f32.mrf.mxu1 }
 0x3f9   :  { %773 = vst [vmem:[#allocation10 + $0x78] sm:$0xff] %v1016_v6 }
 0x3fa   :  { %v746_v7 = vpop.f32.mrf.mxu1 }
 0x3fb   :  { %771 = vst [vmem:[#allocation10 + $0x68] sm:$0xff] %v746_v7 }
 0x3fc   :  { %1149 = shalt.err (!%p1146_p10)
}
 0x3fd   :  { %s1173_s10 = smov 128   ;;  %s1174_s11 = smov 8  }
 0x3fe   :  { %785 = dma.vmem_to_hbm [thread:$0]  %s780_s3, 2048, %s1263_s4, [#allocation4], %s1173_s10, %s1173_s10, %s1174_s11  }
 0x3ff   :  { %1164 = dma.done.wait [#allocation4], 2048  }
 0x400   :  { %1165 = vsyncadd [#allocation4], 4294965248 }
 0x401   :  { %789 = vsyncpa [#allocation3], 1 }
 0x402   :  { %790 = vsyncpa [#allocation6], 1 }
 0x403   :  { %791 = vsyncpa [#allocation9], 1 }
 0x404   :  { %792 = vsyncpa [#allocation4], 1 }

</bundles_post_ra>
